<compile_context>
chip_gen: v6e
topology: v6e:2x2x1
jax: 0.10.0
libtpu: 0.0.40
codegen_flags: <defaults>
</compile_context>

<pallas_src>
import jax
import jax.numpy as jnp
from jax.experimental import pallas as pl
from jax.experimental.pallas import tpu as pltpu


def _round_up(n, m):
    return ((n + m - 1) // m) * m


def actor_kernel(x_ref, w1_ref, b1_ref, w2_ref, b2_ref, w3_ref, b3_ref, o_ref):
    x = x_ref[...]  # (tm, in_pad) bf16
    # fc1 + ReLU  (bf16 operands, f32 accumulation on the MXU)
    h1 = jnp.dot(x, w1_ref[...], preferred_element_type=jnp.float32) + b1_ref[...]
    h1 = jnp.maximum(h1, 0.0).astype(jnp.bfloat16)
    # fc2 + ReLU
    h2 = jnp.dot(h1, w2_ref[...], preferred_element_type=jnp.float32) + b2_ref[...]
    h2 = jnp.maximum(h2, 0.0).astype(jnp.bfloat16)
    # mu + tanh (tanh in f32, stored bf16)
    out = jnp.dot(h2, w3_ref[...], preferred_element_type=jnp.float32) + b3_ref[...]
    o_ref[...] = jnp.tanh(out).astype(o_ref.dtype)


def actor_forward_padded(xp, params):
    """Low-overhead entry point: xp is already padded bf16 of shape (pb, in_pad).

    Returns the padded bf16 output of shape (pb, out_pad). Callers on the
    tiny-batch rollout path can keep xp as a persistent buffer and avoid the
    wrapper pad / slice ops entirely.
    """
    w1, b1 = params["w1"], params["b1"]
    w2, b2 = params["w2"], params["b2"]
    w3, b3 = params["w3"], params["b3"]

    pb, in_pad = xp.shape
    h1_pad = w1.shape[1]
    h2_pad = w2.shape[1]
    out_pad = w3.shape[1]
    assert in_pad == w1.shape[0]
    assert pb % 16 == 0, "padded batch must be a multiple of 16 (bf16 sublane tile)"

    # Row tile: up to 256 rows per step (fills the 256x256 MXU on v6e/v7x and
    # amortizes per-step overhead on v5e); multi-step grids shard across TCs.
    tm = min(pb, 256)
    assert pb % tm == 0
    grid = (pb // tm,)

    return pl.pallas_call(
        actor_kernel,
        out_shape=jax.ShapeDtypeStruct((pb, out_pad), jnp.bfloat16),
        grid_spec=pltpu.PrefetchScalarGridSpec(
            num_scalar_prefetch=0,
            grid=grid,
            in_specs=[
                pl.BlockSpec((tm, in_pad), lambda i: (i, 0)),
                # Weights / biases: constant block index -> fetched once and
                # VMEM-resident across all batch-grid steps (~0.6 MiB total).
                pl.BlockSpec((in_pad, h1_pad), lambda i: (0, 0)),
                pl.BlockSpec((1, h1_pad), lambda i: (0, 0)),
                pl.BlockSpec((h1_pad, h2_pad), lambda i: (0, 0)),
                pl.BlockSpec((1, h2_pad), lambda i: (0, 0)),
                pl.BlockSpec((h2_pad, out_pad), lambda i: (0, 0)),
                pl.BlockSpec((1, out_pad), lambda i: (0, 0)),
            ],
            out_specs=pl.BlockSpec((tm, out_pad), lambda i: (i, 0)),
        ),
        compiler_params=pltpu.CompilerParams(
            dimension_semantics=("parallel",),  # batch tiles shard across TCs on v7x
        ),
    )(xp, w1, b1, w2, b2, w3, b3)


def actor_forward(x, params):
    """x: (batch, input_dim) float32 -> (batch, n_actions) float32."""
    n_actions = params["n_actions"]
    input_dim = params["input_dim"]
    in_pad = params["w1"].shape[0]

    batch = x.shape[0]
    # Batch padded to a multiple of 16 (bf16 sublane group) and of the row tile.
    pb = _round_up(max(batch, 16), 16)
    tm = min(pb, 256)
    pb = _round_up(pb, tm)

    # Single pad+cast op (zero padding is exact through matmul/relu/tanh).
    xp = jnp.pad(
        x.astype(jnp.bfloat16),
        ((0, pb - batch), (0, in_pad - input_dim)),
    )

    out_padded = actor_forward_padded(xp, params)

    # De-pad and restore the module's f32 output dtype (single fused slice+cast).
    return out_padded[:batch, :n_actions].astype(jnp.float32)


def init_actor_params(key, input_dim, n_actions, fc1_dims=300, fc2_dims=400):
    """PyTorch-Linear-style init (U(-1/sqrt(fan_in), +1/sqrt(fan_in))).

    Weights are stored transposed (in_features, out_features), zero-padded to
    hardware-friendly shapes, and cast to bf16:
        input_dim -> round_up(., 16)   (bf16 sublane multiple; only K of fc1)
        fc1/fc2/mu out dims -> round_up(., 128)  (lane-aligned)
    Biases are stored as (1, out_pad) f32 with zero padding (padding exact).
    """
    keys = jax.random.split(key, 6)

    in_pad = _round_up(input_dim, 16)     # 8   -> 16   (not 128: 8x less w1 DMA)
    h1_pad = _round_up(fc1_dims, 128)     # 300 -> 384
    h2_pad = _round_up(fc2_dims, 128)     # 400 -> 512
    out_pad = _round_up(n_actions, 128)   # 4   -> 128

    def linear(kw, kb, fan_in, fan_out, fan_in_pad, fan_out_pad):
        bound = 1.0 / float(fan_in) ** 0.5
        w = jax.random.uniform(kw, (fan_in, fan_out), jnp.float32, -bound, bound)
        b = jax.random.uniform(kb, (1, fan_out), jnp.float32, -bound, bound)
        w_p = jnp.zeros((fan_in_pad, fan_out_pad), jnp.float32).at[:fan_in, :fan_out].set(w)
        b_p = jnp.zeros((1, fan_out_pad), jnp.float32).at[:, :fan_out].set(b)
        return w_p.astype(jnp.bfloat16), b_p

    w1, b1 = linear(keys[0], keys[1], input_dim, fc1_dims, in_pad, h1_pad)
    w2, b2 = linear(keys[2], keys[3], fc1_dims, fc2_dims, h1_pad, h2_pad)
    w3, b3 = linear(keys[4], keys[5], fc2_dims, n_actions, h2_pad, out_pad)
    return {
        "w1": w1, "b1": b1,
        "w2": w2, "b2": b2,
        "w3": w3, "b3": b3,
        "input_dim": input_dim,
        "n_actions": n_actions,
    }


def _reference_forward(x, params):
    """Pure-JAX reference mirroring the kernel's precision (bf16 in / f32 acc).

    Note: bf16 weights/activations differ from a pure-f32 PyTorch run by up to
    ~1e-2 in tanh outputs; this reference intentionally matches the kernel's
    precision contract.
    """
    in_pad = params["w1"].shape[0]
    batch, input_dim = x.shape
    xp = jnp.pad(x.astype(jnp.bfloat16), ((0, 0), (0, in_pad - input_dim)))
    h1 = jnp.dot(xp, params["w1"], preferred_element_type=jnp.float32) + params["b1"]
    h1 = jnp.maximum(h1, 0.0).astype(jnp.bfloat16)
    h2 = jnp.dot(h1, params["w2"], preferred_element_type=jnp.float32) + params["b2"]
    h2 = jnp.maximum(h2, 0.0).astype(jnp.bfloat16)
    out = jnp.dot(h2, params["w3"], preferred_element_type=jnp.float32) + params["b3"]
    out = jnp.tanh(out).astype(jnp.bfloat16).astype(jnp.float32)
    return out[:batch, :params["n_actions"]]


if __name__ == "__main__":
    key = jax.random.PRNGKey(0)
    k_params, k_x = jax.random.split(key)

    batch = 2
    input_dim = 8       # input_shape = (8,)
    n_actions = 4
    fc1_dims, fc2_dims = 300, 400

    params = init_actor_params(k_params, input_dim, n_actions, fc1_dims, fc2_dims)
    x = jax.random.normal(k_x, (batch, input_dim), jnp.float32)

    out = actor_forward(x, params)
    out = jax.block_until_ready(out)

    ref = _reference_forward(x, params)
    assert out.shape == (batch, n_actions), f"bad shape {out.shape}"
    assert out.dtype == jnp.float32
    assert jnp.allclose(out, ref, atol=1e-2), "mismatch vs reference"

    print("KERNEL_OK")
</pallas_src>

<mosaic_0001>
module attributes {stable_mosaic.version = 11 : i64} {
  func.func @actor_kernel(%arg0: i32, %arg1: memref<16x16xbf16, #tpu.memory_space<vmem>>, %arg2: memref<16x384xbf16, #tpu.memory_space<vmem>>, %arg3: memref<1x384xf32, #tpu.memory_space<vmem>>, %arg4: memref<384x512xbf16, #tpu.memory_space<vmem>>, %arg5: memref<1x512xf32, #tpu.memory_space<vmem>>, %arg6: memref<512x128xbf16, #tpu.memory_space<vmem>>, %arg7: memref<1x128xf32, #tpu.memory_space<vmem>>, %arg8: memref<16x128xbf16, #tpu.memory_space<vmem>>) attributes {dimension_semantics = [#tpu.dimension_semantics<parallel>], iteration_bounds = array<i64: 1>, scalar_prefetch = 0 : i64, scratch_operands = 0 : i64, tpu.core_type = #tpu.core_type<tc>, window_params = [{transform_indices = @transform_0, window_bounds = array<i64: 16, 16>}, {pipeline_mode = #tpu.pipeline_mode<synchronous>, transform_indices = @transform_1, window_bounds = array<i64: 16, 384>}, {pipeline_mode = #tpu.pipeline_mode<synchronous>, transform_indices = @transform_2, window_bounds = array<i64: 1, 384>}, {pipeline_mode = #tpu.pipeline_mode<synchronous>, transform_indices = @transform_3, window_bounds = array<i64: 384, 512>}, {pipeline_mode = #tpu.pipeline_mode<synchronous>, transform_indices = @transform_4, window_bounds = array<i64: 1, 512>}, {pipeline_mode = #tpu.pipeline_mode<synchronous>, transform_indices = @transform_5, window_bounds = array<i64: 512, 128>}, {pipeline_mode = #tpu.pipeline_mode<synchronous>, transform_indices = @transform_6, window_bounds = array<i64: 1, 128>}, {transform_indices = @transform_7, window_bounds = array<i64: 16, 128>}]} {
    %c0 = arith.constant 0 : index
    %c0_0 = arith.constant 0 : index
    %0 = vector.load %arg1[%c0, %c0_0] : memref<16x16xbf16, #tpu.memory_space<vmem>>, vector<16x16xbf16>
    %c0_1 = arith.constant 0 : index
    %c0_2 = arith.constant 0 : index
    %1 = vector.load %arg2[%c0_1, %c0_2] : memref<16x384xbf16, #tpu.memory_space<vmem>>, vector<16x384xbf16>
    %cst = arith.constant dense<0.000000e+00> : vector<16x384xf32>
    %2 = tpu.matmul %0, %1, %cst {dimension_numbers = #tpu.dot_dimension_numbers<[1], [0], [0], [1], [0, 0, 1, 1], [], []>} : vector<16x16xbf16>, vector<16x384xbf16>, vector<16x384xf32> -> vector<16x384xf32>
    %c0_3 = arith.constant 0 : index
    %c0_4 = arith.constant 0 : index
    %3 = vector.load %arg3[%c0_3, %c0_4] : memref<1x384xf32, #tpu.memory_space<vmem>>, vector<1x384xf32>
    %4 = vector.broadcast %3 : vector<1x384xf32> to vector<16x384xf32>
    %5 = arith.addf %2, %4 : vector<16x384xf32>
    %cst_5 = arith.constant 0.000000e+00 : f32
    %6 = vector.broadcast %cst_5 : f32 to vector<16x384xf32>
    %7 = arith.maximumf %5, %6 : vector<16x384xf32>
    %8 = arith.truncf %7 : vector<16x384xf32> to vector<16x384xbf16>
    %c0_6 = arith.constant 0 : index
    %c0_7 = arith.constant 0 : index
    %9 = vector.load %arg4[%c0_6, %c0_7] : memref<384x512xbf16, #tpu.memory_space<vmem>>, vector<384x512xbf16>
    %cst_8 = arith.constant dense<0.000000e+00> : vector<16x512xf32>
    %10 = tpu.matmul %8, %9, %cst_8 {dimension_numbers = #tpu.dot_dimension_numbers<[1], [0], [0], [1], [0, 0, 1, 1], [], []>} : vector<16x384xbf16>, vector<384x512xbf16>, vector<16x512xf32> -> vector<16x512xf32>
    %c0_9 = arith.constant 0 : index
    %c0_10 = arith.constant 0 : index
    %11 = vector.load %arg5[%c0_9, %c0_10] : memref<1x512xf32, #tpu.memory_space<vmem>>, vector<1x512xf32>
    %12 = vector.broadcast %11 : vector<1x512xf32> to vector<16x512xf32>
    %13 = arith.addf %10, %12 : vector<16x512xf32>
    %cst_11 = arith.constant 0.000000e+00 : f32
    %14 = vector.broadcast %cst_11 : f32 to vector<16x512xf32>
    %15 = arith.maximumf %13, %14 : vector<16x512xf32>
    %16 = arith.truncf %15 : vector<16x512xf32> to vector<16x512xbf16>
    %c0_12 = arith.constant 0 : index
    %c0_13 = arith.constant 0 : index
    %17 = vector.load %arg6[%c0_12, %c0_13] : memref<512x128xbf16, #tpu.memory_space<vmem>>, vector<512x128xbf16>
    %cst_14 = arith.constant dense<0.000000e+00> : vector<16x128xf32>
    %18 = tpu.matmul %16, %17, %cst_14 {dimension_numbers = #tpu.dot_dimension_numbers<[1], [0], [0], [1], [0, 0, 1, 1], [], []>} : vector<16x512xbf16>, vector<512x128xbf16>, vector<16x128xf32> -> vector<16x128xf32>
    %c0_15 = arith.constant 0 : index
    %c0_16 = arith.constant 0 : index
    %19 = vector.load %arg7[%c0_15, %c0_16] : memref<1x128xf32, #tpu.memory_space<vmem>>, vector<1x128xf32>
    %20 = vector.broadcast %19 : vector<1x128xf32> to vector<16x128xf32>
    %21 = arith.addf %18, %20 : vector<16x128xf32>
    %22 = math.tanh %21 : vector<16x128xf32>
    %23 = arith.truncf %22 : vector<16x128xf32> to vector<16x128xbf16>
    %c0_17 = arith.constant 0 : index
    %c0_18 = arith.constant 0 : index
    %24 = vector.load %arg8[%c0_17, %c0_18] : memref<16x128xbf16, #tpu.memory_space<vmem>>, vector<16x128xbf16>
    tpu.vector_store %arg8[%c0_17, %c0_18], %23 {strides = array<i32>} : memref<16x128xbf16, #tpu.memory_space<vmem>>, vector<16x128xbf16>,
    return
  }
  func.func @transform_0(%arg0: i32) -> (i32, i32) {
    %c0_i32 = arith.constant 0 : i32
    %c0_i32_0 = arith.constant 0 : i32
    return %arg0, %c0_i32 : i32, i32
  }
  func.func @transform_1(%arg0: i32) -> (i32, i32) {
    %c0_i32 = arith.constant 0 : i32
    %c0_i32_0 = arith.constant 0 : i32
    %c0_i32_1 = arith.constant 0 : i32
    return %c0_i32, %c0_i32_0 : i32, i32
  }
  func.func @transform_2(%arg0: i32) -> (i32, i32) {
    %c0_i32 = arith.constant 0 : i32
    %c0_i32_0 = arith.constant 0 : i32
    %c0_i32_1 = arith.constant 0 : i32
    return %c0_i32, %c0_i32_0 : i32, i32
  }
  func.func @transform_3(%arg0: i32) -> (i32, i32) {
    %c0_i32 = arith.constant 0 : i32
    %c0_i32_0 = arith.constant 0 : i32
    %c0_i32_1 = arith.constant 0 : i32
    return %c0_i32, %c0_i32_0 : i32, i32
  }
  func.func @transform_4(%arg0: i32) -> (i32, i32) {
    %c0_i32 = arith.constant 0 : i32
    %c0_i32_0 = arith.constant 0 : i32
    %c0_i32_1 = arith.constant 0 : i32
    return %c0_i32, %c0_i32_0 : i32, i32
  }
  func.func @transform_5(%arg0: i32) -> (i32, i32) {
    %c0_i32 = arith.constant 0 : i32
    %c0_i32_0 = arith.constant 0 : i32
    %c0_i32_1 = arith.constant 0 : i32
    return %c0_i32, %c0_i32_0 : i32, i32
  }
  func.func @transform_6(%arg0: i32) -> (i32, i32) {
    %c0_i32 = arith.constant 0 : i32
    %c0_i32_0 = arith.constant 0 : i32
    %c0_i32_1 = arith.constant 0 : i32
    return %c0_i32, %c0_i32_0 : i32, i32
  }
  func.func @transform_7(%arg0: i32) -> (i32, i32) {
    %c0_i32 = arith.constant 0 : i32
    %c0_i32_0 = arith.constant 0 : i32
    return %arg0, %c0_i32 : i32, i32
  }
}

</mosaic_0001>

<bundles_post_ra>
// kernel: tpu_custom_call.1
= control target key start
LH: loop header
LB: loop body
LE: loop exit
PB: predicated region body
PF: predicated region fallthrough
CT: control target
= control target key end

     0   :  { %12 = vsyncpa [#allocation3], 0  ;;  %s2001_s0 = inlined_call_operand.hbm [shape: bf16[16,16], index: 0, kind: input, shape index: {}]   ;;  %s2002_s1 = inlined_call_operand.hbm [shape: bf16[16,384], index: 1, kind: input, shape index: {}]   ;;  %s2003_s2 = inlined_call_operand.vmem [shape: f32[1,384], index: 2, kind: input, shape index: {}]   ;;  %s2004_s3 = inlined_call_operand.hbm [shape: bf16[384,512], index: 3, kind: input, shape index: {}]   ;;  %s2005_s4 = inlined_call_operand.vmem [shape: f32[1,512], index: 4, kind: input, shape index: {}]   ;;  %s2006_s5 = inlined_call_operand.hbm [shape: bf16[512,128], index: 5, kind: input, shape index: {}]   ;;  %s2007_s6 = inlined_call_operand.vmem [shape: f32[1,128], index: 6, kind: input, shape index: {}]   ;;  %s2008_s7 = inlined_call_operand.hbm [shape: bf16[16,128], index: 7, kind: output, shape index: {}]  }
   0x1   :  { %13 = vsyncpa [#allocation6], 0 }
   0x2   :  { %14 = vsyncpa [#allocation9], 0 }
   0x3   :  { %15 = vsyncpa [#allocation4], 0  ;;  %s1885_s24 = smov [#allocation5]  }
   0x4   :  { %s33_s25 = sshll.u32 %s1885_s24, 4  ;;  %s34_s25 = int_to_ptr.vmem [resolvable:$true] %s33_s25 }
   0x5   :  { %s1785_s26 = scalar_lea.vmem %s34_s25, 384  ;;  %p1790_p1 = scmp.lt.s32.totalorder %s34_s25, %s34_s25 }
   0x6   :  { %p1786_p0 = scmp.ne.s32.totalorder %s34_s25, %s1785_s26  ;;  %p1791_p2 = scmp.lt.s32.totalorder %s1785_s26, %s1785_s26 }
   0x8   :  { %p1792_p3 = por %p1791_p2, %p1790_p1 }
   0xa   :  { %p1793_p4 = pnand %p1792_p3, %p1786_p0 }
   0xc   :  { %1796 = shalt.err (!%p1793_p4)
}
   0xd   :  { %s1886_s27 = smov 192   ;;  %s1887_s28 = smov 12  }
   0xe   :  { %39 = dma.hbm_to_vmem [thread:$0]  %s2002_s1, 384, %s34_s25, [#allocation6], %s1886_s27, %s1886_s27, %s1887_s28  }
   0xf   :  { %s1888_s8 = smov [#allocation2]  }
  0x10   :  { %s21_s9 = sshll.u32 %s1888_s8, 4  ;;  %s22_s9 = int_to_ptr.vmem [resolvable:$true] %s21_s9 }
  0x11   :  { %s1805_s10 = scalar_lea.vmem %s22_s9, 128  ;;  %p1810_p6 = scmp.lt.s32.totalorder %s22_s9, %s22_s9 }
  0x12   :  { %p1806_p5 = scmp.ne.s32.totalorder %s22_s9, %s1805_s10  ;;  %p1811_p7 = scmp.lt.s32.totalorder %s1805_s10, %s1805_s10 }
  0x14   :  { %p1812_p8 = por %p1811_p7, %p1810_p6 }
  0x16   :  { %p1813_p9 = pnand %p1812_p8, %p1806_p5 }
  0x18   :  { %1816 = shalt.err (!%p1813_p9)
}
  0x19   :  { %s1889_s11 = smov 64   ;;  %s1890_s12 = smov 4  }
  0x1a   :  { %27 = dma.hbm_to_vmem [thread:$0]  %s2001_s0, 128, %s22_s9, [#allocation3], %s1889_s11, %s1889_s11, %s1890_s12  }
  0x1b   :  { %s1891_s1 = smov [#allocation7]  }
  0x1c   :  { %s47_s15 = sshll.u32 %s1891_s1, 4  ;;  %s48_s15 = int_to_ptr.vmem [resolvable:$true] %s47_s15 }
  0x1d   :  { %s1825_s16 = scalar_lea.vmem %s48_s15, 12288  ;;  %p1830_p11 = scmp.lt.s32.totalorder %s48_s15, %s48_s15 }
  0x1e   :  { %p1826_p10 = scmp.ne.s32.totalorder %s48_s15, %s1825_s16  ;;  %p1831_p12 = scmp.lt.s32.totalorder %s1825_s16, %s1825_s16 }
  0x20   :  { %p1832_p13 = por %p1831_p12, %p1830_p11 }
  0x22   :  { %p1833_p0 = pnand %p1832_p13, %p1826_p10 }
  0x24   :  { %1836 = shalt.err (!%p1833_p0)
}
  0x25   :  { %s1892_s17 = smov 256   ;;  %s1893_s18 = smov 16  }
  0x26   :  { %53 = dma.hbm_to_vmem [thread:$0]  %s2004_s3, 12288, %s48_s15, [#allocation6], %s1892_s17, %s1892_s17, %s1893_s18  }
  0x27   :  { %s1894_s21 = smov [#allocation8]  }
  0x28   :  { %s61_s22 = sshll.u32 %s1894_s21, 4  ;;  %s62_s22 = int_to_ptr.vmem [resolvable:$true] %s61_s22 }
  0x29   :  { %s1845_s0 = scalar_lea.vmem %s62_s22, 4096  ;;  %p1850_p2 = scmp.lt.s32.totalorder %s62_s22, %s62_s22 }
  0x2a   :  { %p1846_p1 = scmp.ne.s32.totalorder %s62_s22, %s1845_s0  ;;  %p1851_p3 = scmp.lt.s32.totalorder %s1845_s0, %s1845_s0 }
  0x2c   :  { %p1852_p4 = por %p1851_p3, %p1850_p2 }
  0x2e   :  { %p1853_p5 = pnand %p1852_p4, %p1846_p1 }
  0x30   :  { %1856 = shalt.err (!%p1853_p5)
}
  0x31   :  { %67 = dma.hbm_to_vmem [thread:$0]  %s2006_s5, 4096, %s62_s22, [#allocation9], %s1889_s11, %s1889_s11, %s1890_s12  }
  0x32   :  { %1877 = dma.done.wait [#allocation3], 128  }
  0x33   :  { %1878 = vsyncadd [#allocation3], 4294967168 }
  0x34   :  { %1879 = dma.done.wait [#allocation6], 12672  }
  0x35   :  { %1880 = vsyncadd [#allocation6], 4294954624 }
  0x36   :  { %1881 = dma.done.wait [#allocation9], 4096  }
  0x37   :  { %1882 = vsyncadd [#allocation9], 4294963200  ;;  %v1895_v0 = vmov 0.0   ;;  %vm1896_vm0 = vmmov 0   ;;  %v1897_v1 = vmov 0   ;;  %v1596_v5 = vld [vmem:[#allocation2] sm:$0xff]   ;;  %v91_v56 = vlaneseq }
  0x38   :  { %1572 = vmatprep.subr.bf16.mxu1 %v1895_v0  ;;  %1574 = vmatprep.mubr.msk.bf16.mxu1 %vm1896_vm0, %v1895_v0  ;;  %v1592_v2 = vld [vmem:[#allocation5 + $0x4] ss:$12 sps:$4 sm:$0xff]   ;;  %v1594_v3 = vld [vmem:[#allocation5 + $0x8] ss:$12 sps:$4 sm:$0xff]   ;;  %v1595_v4 = vld [vmem:[#allocation5] ss:$12 sps:$4 sm:$0xff]  }
  0x39   :  { %163 = vmatprep.mubr.bf16.mxu0 %v1897_v1  ;;  %145 = vmatprep.subr.bf16.mxu0 %v1592_v2  ;;  %vm127_vm1 = vcmask 130048   ;;  %v1597_v6 = vld [vmem:[#allocation7 + $0xe0] ss:$16 sps:$4 sm:$0xff]   ;;  %v1599_v7 = vld [vmem:[#allocation7 + $0xe4] ss:$16 sps:$4 sm:$0xff]   ;;  %v1959_v57 = vshrl.u32 %v91_v56, 7 }
  0x3a   :  { %1573 = vmatpush3.bf16.msra.mxu1 %v1594_v3  ;;  %146 = vmatpush1.bf16.msra.mxu0 %v1595_v4  ;;  %v1602_v8 = vld [vmem:[#allocation7 + $0xc4] ss:$16 sps:$4 sm:$0xff]   ;;  %v1600_v9 = vld [vmem:[#allocation7 + $0xc0] ss:$16 sps:$4 sm:$0xff]   ;;  %v1671_v53 = vld [vmem:[#allocation7 + $0xec] ss:$16 sps:$4 sm:$0xff]  }
  0x3b   :  { %822 = vmatprep.subr.bf16.mxu0 %v1599_v7  ;;  %v1605_v10 = vld [vmem:[#allocation7 + $0xa4] ss:$16 sps:$4 sm:$0xff]   ;;  %v1603_v11 = vld [vmem:[#allocation7 + $0xa0] ss:$16 sps:$4 sm:$0xff]   ;;  %v1677_v55 = vld [vmem:[#allocation7 + $0x2ec] ss:$16 sps:$4 sm:$0xff]  }
  0x3c   :  { %v1608_v12 = vld [vmem:[#allocation7 + $0x84] ss:$16 sps:$4 sm:$0xff]   ;;  %v1621_v13 = vld [vmem:[#allocation7 + $0x2e0] ss:$16 sps:$4 sm:$0xff]   ;;  %v101_v58 = vsub.s32 2, %v1959_v57  ;;  %v93_v59 = vsub.s32 0, %v1959_v57 }
  0x3d   :  { %1575 = vmatmul.mubr.msk.bf16.vlgmr.msra.gmra.mxu1 %vm127_vm1, %v1596_v5  ;;  %1386 = vmatmul.mubr.msk.bf16.vlgmr.msra.gmra.mxu0 %vm127_vm1, %v1596_v5  ;;  %v1623_v14 = vld [vmem:[#allocation7 + $0x2e4] ss:$16 sps:$4 sm:$0xff]   ;;  %v1606_v15 = vld [vmem:[#allocation7 + $0x80] ss:$16 sps:$4 sm:$0xff]   ;;  %v97_v61 = vsub.s32 1, %v1959_v57  ;;  %s1898_s27 = smov [#allocation10]  }
  0x3e   :  { %897 = vmatprep.mubr.bf16.mxu1 %v1897_v1  ;;  %823 = vmatpush1.bf16.msra.mxu0 %v1597_v6  ;;  %v1611_v16 = vld [vmem:[#allocation7 + $0x64] ss:$16 sps:$4 sm:$0xff]   ;;  %v1627_v18 = vld [vmem:[#allocation7 + $0x2c0] ss:$16 sps:$4 sm:$0xff]   ;;  %v1722_v56 = vld [vmem:[#allocation7 + $0x1cc] ss:$16 sps:$4 sm:$0xff]  }
  0x3f   :  { %824 = vmatprep.subr.bf16.mxu0 %v1602_v8  ;;  %865 = vmatprep.subr.bf16.mxu1 %v1623_v14  ;;  %v1629_v17 = vld [vmem:[#allocation7 + $0x2c4] ss:$16 sps:$4 sm:$0xff]   ;;  %v1609_v19 = vld [vmem:[#allocation7 + $0x60] ss:$16 sps:$4 sm:$0xff]   ;;  %s1368_s28 = sshll.u32 %s1898_s27, 4  ;;  %s1369_s28 = int_to_ptr.vmem [resolvable:$true] %s1368_s28 }
  0x40   :  { %866 = vmatpush1.bf16.msra.mxu1 %v1621_v13  ;;  %v1635_v20 = vld [vmem:[#allocation7 + $0x2a4] ss:$16 sps:$4 sm:$0xff]   ;;  %v1633_v22 = vld [vmem:[#allocation7 + $0x2a0] ss:$16 sps:$4 sm:$0xff]   ;;  %p1862_p7 = scmp.lt.s32.totalorder %s1369_s28, %s1369_s28 }
  0x41   :  { %867 = vmatprep.subr.bf16.mxu1 %v1629_v17  ;;  %v1614_v21 = vld [vmem:[#allocation7 + $0x44] ss:$16 sps:$4 sm:$0xff]   ;;  %v1612_v24 = vld [vmem:[#allocation7 + $0x40] ss:$16 sps:$4 sm:$0xff]  }
  0x42   :  { %825 = vmatpush1.bf16.msra.mxu0 %v1600_v9  ;;  %v1641_v23 = vld [vmem:[#allocation7 + $0x284] ss:$16 sps:$4 sm:$0xff]   ;;  %v1639_v26 = vld [vmem:[#allocation7 + $0x280] ss:$16 sps:$4 sm:$0xff]  }
  0x43   :  { %826 = vmatprep.subr.bf16.mxu0 %v1605_v10  ;;  %v1617_v25 = vld [vmem:[#allocation7 + $0x24] ss:$16 sps:$4 sm:$0xff]   ;;  %v1615_v28 = vld [vmem:[#allocation7 + $0x20] ss:$16 sps:$4 sm:$0xff]  }
  0x44   :  { %868 = vmatpush1.bf16.msra.mxu1 %v1627_v18  ;;  %v1647_v27 = vld [vmem:[#allocation7 + $0x264] ss:$16 sps:$4 sm:$0xff]   ;;  %v1645_v30 = vld [vmem:[#allocation7 + $0x260] ss:$16 sps:$4 sm:$0xff]  }
  0x45   :  { %869 = vmatprep.subr.bf16.mxu1 %v1635_v20  ;;  %v1620_v29 = vld [vmem:[#allocation7 + $0x4] ss:$16 sps:$4 sm:$0xff]   ;;  %v1618_v32 = vld [vmem:[#allocation7] ss:$16 sps:$4 sm:$0xff]  }
  0x46   :  { %827 = vmatpush1.bf16.msra.mxu0 %v1603_v11  ;;  %v1653_v31 = vld [vmem:[#allocation7 + $0x244] ss:$16 sps:$4 sm:$0xff]   ;;  %v1651_v34 = vld [vmem:[#allocation7 + $0x240] ss:$16 sps:$4 sm:$0xff]  }
  0x47   :  { %828 = vmatprep.subr.bf16.mxu0 %v1608_v12  ;;  %v1626_v33 = vld [vmem:[#allocation7 + $0x1e4] ss:$16 sps:$4 sm:$0xff]   ;;  %v1624_v35 = vld [vmem:[#allocation7 + $0x1e0] ss:$16 sps:$4 sm:$0xff]  }
  0x48   :  { %870 = vmatpush1.bf16.msra.mxu1 %v1633_v22  ;;  %v1632_v36 = vld [vmem:[#allocation7 + $0x1c4] ss:$16 sps:$4 sm:$0xff]   ;;  %v1630_v37 = vld [vmem:[#allocation7 + $0x1c0] ss:$16 sps:$4 sm:$0xff]  }
  0x49   :  { %871 = vmatprep.subr.bf16.mxu1 %v1641_v23  ;;  %v1638_v38 = vld [vmem:[#allocation7 + $0x1a4] ss:$16 sps:$4 sm:$0xff]   ;;  %v1636_v39 = vld [vmem:[#allocation7 + $0x1a0] ss:$16 sps:$4 sm:$0xff]   ;;  %v1674_v23 = vld [vmem:[#allocation7 + $0xcc] ss:$16 sps:$4 sm:$0xff]  }
  0x4a   :  { %829 = vmatpush1.bf16.msra.mxu0 %v1606_v15  ;;  %v1644_v40 = vld [vmem:[#allocation7 + $0x184] ss:$16 sps:$4 sm:$0xff]   ;;  %v1642_v41 = vld [vmem:[#allocation7 + $0x180] ss:$16 sps:$4 sm:$0xff]  }
  0x4b   :  { %830 = vmatprep.subr.bf16.mxu0 %v1611_v16  ;;  %v1650_v42 = vld [vmem:[#allocation7 + $0x164] ss:$16 sps:$4 sm:$0xff]   ;;  %v1648_v43 = vld [vmem:[#allocation7 + $0x160] ss:$16 sps:$4 sm:$0xff]  }
  0x4c   :  { %872 = vmatpush1.bf16.msra.mxu1 %v1639_v26  ;;  %v1656_v44 = vld [vmem:[#allocation7 + $0x144] ss:$16 sps:$4 sm:$0xff]   ;;  %v1654_v46 = vld [vmem:[#allocation7 + $0x140] ss:$16 sps:$4 sm:$0xff]  }
  0x4d   :  { %873 = vmatprep.subr.bf16.mxu1 %v1647_v27  ;;  %v1659_v45 = vld [vmem:[#allocation7 + $0x224] ss:$16 sps:$4 sm:$0xff]   ;;  %v1657_v47 = vld [vmem:[#allocation7 + $0x220] ss:$16 sps:$4 sm:$0xff]   ;;  %v1672_v27 = vld [vmem:[#allocation7 + $0xc8] ss:$16 sps:$4 sm:$0xff]  }
  0x4e   :  { %831 = vmatpush1.bf16.msra.mxu0 %v1609_v19  ;;  %v1662_v48 = vld [vmem:[#allocation7 + $0x124] ss:$16 sps:$4 sm:$0xff]   ;;  %v1660_v50 = vld [vmem:[#allocation7 + $0x120] ss:$16 sps:$4 sm:$0xff]  }
  0x4f   :  { %832 = vmatprep.subr.bf16.mxu0 %v1614_v21  ;;  %v1665_v49 = vld [vmem:[#allocation7 + $0x204] ss:$16 sps:$4 sm:$0xff]   ;;  %v1663_v51 = vld [vmem:[#allocation7 + $0x200] ss:$16 sps:$4 sm:$0xff]   ;;  %v1669_v21 = vld [vmem:[#allocation7 + $0xe8] ss:$16 sps:$4 sm:$0xff]  }
  0x50   :  { %874 = vmatpush1.bf16.msra.mxu1 %v1645_v30  ;;  %v1668_v52 = vld [vmem:[#allocation7 + $0x104] ss:$16 sps:$4 sm:$0xff]   ;;  %v1666_v54 = vld [vmem:[#allocation7 + $0x100] ss:$16 sps:$4 sm:$0xff]   ;;  %v1683_v30 = vld [vmem:[#allocation7 + $0x2cc] ss:$16 sps:$4 sm:$0xff]  }
  0x51   :  { %875 = vmatprep.subr.bf16.mxu1 %v1653_v31  ;;  %v89_v60 = vld [vmem:[%s2003_s2] sm:$0x7]  ;;  %v1678_v31 = vld [vmem:[#allocation7 + $0xa8] ss:$16 sps:$4 sm:$0xff]  }
  0x52   :  { %833 = vmatpush1.bf16.msra.mxu0 %v1612_v24  ;;  %v102_v62 = vrot.slane %v89_v60, %v101_v58  ;;  %v94_v63 = vrot.slane %v89_v60, %v93_v59  ;;  %v98_v2 = vrot.slane %v89_v60, %v97_v61  ;;  %v1741_v60 = vld [vmem:[#allocation8 + $0x78] sm:$0xff]  }
  0x53   :  { %834 = vmatprep.subr.bf16.mxu0 %v1617_v25 }
  0x54   :  { %876 = vmatpush1.bf16.msra.mxu1 %v1651_v34  ;;  %v1689_v34 = vld [vmem:[#allocation7 + $0x2ac] ss:$16 sps:$4 sm:$0xff]  }
  0x55   :  { %877 = vmatprep.subr.bf16.mxu1 %v1659_v45  ;;  %v1707_v45 = vld [vmem:[#allocation7 + $0x24c] ss:$16 sps:$4 sm:$0xff]  }
  0x56   :  { %835 = vmatpush1.bf16.msra.mxu0 %v1615_v28  ;;  %v1675_v28 = vld [vmem:[#allocation7 + $0x2e8] ss:$16 sps:$4 sm:$0xff]  }
  0x57   :  { %836 = vmatprep.subr.bf16.mxu0 %v1620_v29  ;;  %v1680_v29 = vld [vmem:[#allocation7 + $0xac] ss:$16 sps:$4 sm:$0xff]  }
  0x58   :  { %878 = vmatpush1.bf16.msra.mxu1 %v1657_v47  ;;  %v1705_v47 = vld [vmem:[#allocation7 + $0x248] ss:$16 sps:$4 sm:$0xff]  }
  0x59   :  { %879 = vmatprep.subr.bf16.mxu1 %v1665_v49  ;;  %v1713_v49 = vld [vmem:[#allocation7 + $0x22c] ss:$16 sps:$4 sm:$0xff]  }
  0x5a   :  { %837 = vmatpush1.bf16.msra.mxu0 %v1618_v32  ;;  %v1681_v32 = vld [vmem:[#allocation7 + $0x2c8] ss:$16 sps:$4 sm:$0xff]  }
  0x5b   :  { %838 = vmatprep.subr.bf16.mxu0 %v1626_v33  ;;  %v1686_v33 = vld [vmem:[#allocation7 + $0x8c] ss:$16 sps:$4 sm:$0xff]  }
  0x5c   :  { %880 = vmatpush1.bf16.msra.mxu1 %v1663_v51  ;;  %v1711_v51 = vld [vmem:[#allocation7 + $0x228] ss:$16 sps:$4 sm:$0xff]  }
  0x5d   :  { %908 = vmatprep.subr.bf16.mxu1 %v1671_v53  ;;  %v1719_v53 = vld [vmem:[#allocation7 + $0x20c] ss:$16 sps:$4 sm:$0xff]  }
  0x5e   :  { %839 = vmatpush2.bf16.msra.mxu0 %v1624_v35  ;;  %v1684_v35 = vld [vmem:[#allocation7 + $0x88] ss:$16 sps:$4 sm:$0xff]  }
  0x5f   :  { %840 = vmatprep.subr.bf16.mxu0 %v1632_v36  ;;  %v1687_v36 = vld [vmem:[#allocation7 + $0x2a8] ss:$16 sps:$4 sm:$0xff]  }
  0x62   :  { %841 = vmatpush2.bf16.msra.mxu0 %v1630_v37  ;;  %v1692_v37 = vld [vmem:[#allocation7 + $0x6c] ss:$16 sps:$4 sm:$0xff]  }
  0x63   :  { %842 = vmatprep.subr.bf16.mxu0 %v1638_v38  ;;  %v1695_v38 = vld [vmem:[#allocation7 + $0x28c] ss:$16 sps:$4 sm:$0xff]  }
  0x66   :  { %843 = vmatpush2.bf16.msra.mxu0 %v1636_v39  ;;  %v1690_v39 = vld [vmem:[#allocation7 + $0x68] ss:$16 sps:$4 sm:$0xff]  }
  0x67   :  { %844 = vmatprep.subr.bf16.mxu0 %v1644_v40  ;;  %v1693_v40 = vld [vmem:[#allocation7 + $0x288] ss:$16 sps:$4 sm:$0xff]  }
  0x6a   :  { %845 = vmatpush2.bf16.msra.mxu0 %v1642_v41  ;;  %v1698_v41 = vld [vmem:[#allocation7 + $0x4c] ss:$16 sps:$4 sm:$0xff]  }
  0x6b   :  { %846 = vmatprep.subr.bf16.mxu0 %v1650_v42  ;;  %v1701_v42 = vld [vmem:[#allocation7 + $0x26c] ss:$16 sps:$4 sm:$0xff]  }
  0x6e   :  { %847 = vmatpush2.bf16.msra.mxu0 %v1648_v43  ;;  %v1696_v43 = vld [vmem:[#allocation7 + $0x48] ss:$16 sps:$4 sm:$0xff]  }
  0x6f   :  { %848 = vmatprep.subr.bf16.mxu0 %v1656_v44  ;;  %v1704_v44 = vld [vmem:[#allocation7 + $0x2c] ss:$16 sps:$4 sm:$0xff]  }
  0x72   :  { %849 = vmatpush2.bf16.msra.mxu0 %v1654_v46  ;;  %v1702_v46 = vld [vmem:[#allocation7 + $0x28] ss:$16 sps:$4 sm:$0xff]  }
  0x73   :  { %850 = vmatprep.subr.bf16.mxu0 %v1662_v48  ;;  %v1710_v48 = vld [vmem:[#allocation7 + $0xc] ss:$16 sps:$4 sm:$0xff]  }
  0x76   :  { %851 = vmatpush2.bf16.msra.mxu0 %v1660_v50  ;;  %v1708_v50 = vld [vmem:[#allocation7 + $0x8] ss:$16 sps:$4 sm:$0xff]  }
  0x77   :  { %852 = vmatprep.subr.bf16.mxu0 %v1668_v52  ;;  %v1716_v52 = vld [vmem:[#allocation7 + $0x1ec] ss:$16 sps:$4 sm:$0xff]  }
  0x7a   :  { %853 = vmatpush2.bf16.msra.mxu0 %v1666_v54  ;;  %v1714_v54 = vld [vmem:[#allocation7 + $0x1e8] ss:$16 sps:$4 sm:$0xff]  }
  0x7b   :  { %951 = vmatprep.subr.bf16.mxu0 %v1677_v55  ;;  %v1717_v55 = vld [vmem:[#allocation7 + $0x208] ss:$16 sps:$4 sm:$0xff]  }
  0xfd   :  { %v208_v0 = vpop.f32.mrf.mxu1  ;;  %v165_v3 = vpop.f32.mrf.mxu0 }
  0xfe   :  { %v209_v5 = vadd.f32 %v208_v0, %v102_v62  ;;  %v166_v6 = vadd.f32 %v165_v3, %v94_v63  ;;  %v1725_v0 = vld [vmem:[#allocation7 + $0x1ac] ss:$16 sps:$4 sm:$0xff]   ;;  %v1723_v3 = vld [vmem:[#allocation7 + $0x1a8] ss:$16 sps:$4 sm:$0xff]  }
  0xff   :  { %v1576_v4 = vpop.f32.mrf.mxu1  ;;  %v167_v7 = vpop.f32.mrf.mxu0 }
 0x100   :  { %v168_v8 = vadd.f32 %v167_v7, %v98_v2  ;;  %v217_v14 = vmax.f32 %v209_v5, 0.0  ;;  %v215_v15 = vmax.f32 %v166_v6, 0.0  ;;  %v1744_v4 = vld [vmem:[#allocation8 + $0x30] sm:$0xff]   ;;  %v1728_v5 = vld [vmem:[#allocation7 + $0x18c] ss:$16 sps:$4 sm:$0xff]  }
 0x101   :  { %v211_v9 = vpop.f32.mrf.mxu1  ;;  %v169_v11 = vpop.f32.mrf.mxu0  ;;  %v1745_v6 = vld [vmem:[#allocation8 + $0x68] sm:$0xff]  }
 0x102   :  { %v212_v10 = vadd.f32 %v211_v9, %v102_v62  ;;  %v170_v12 = vadd.f32 %v169_v11, %v94_v63  ;;  %v216_v18 = vmax.f32 %v168_v8, 0.0  ;;  %v1720_v62 = vld [vmem:[#allocation7 + $0x1c8] ss:$16 sps:$4 sm:$0xff]   ;;  %v1731_v9 = vld [vmem:[#allocation7 + $0x16c] ss:$16 sps:$4 sm:$0xff]  }
 0x103   :  { %v1577_v13 = vpop.f32.mrf.mxu1  ;;  %v171_v17 = vpop.f32.mrf.mxu0  ;;  %v1742_v63 = vld [vmem:[#allocation8 + $0x38] sm:$0xff]   ;;  %v1746_v8 = vld [vmem:[#allocation8 + $0x28] sm:$0xff]  }
 0x104   :  { %v220_v16 = vmax.f32 %v212_v10, 0.0  ;;  %v218_v19 = vmax.f32 %v170_v12, 0.0  ;;  %v172_v20 = vadd.f32 %v171_v17, %v98_v2  ;;  %v1743_v2 = vld [vmem:[#allocation8 + $0x70] sm:$0xff]   ;;  %v1726_v7 = vld [vmem:[#allocation7 + $0x188] ss:$16 sps:$4 sm:$0xff]   ;;  %v1747_v17 = vld [vmem:[#allocation8 + $0x60] sm:$0xff]  }
 0x105   :  { %v1729_v10 = vld [vmem:[#allocation7 + $0x168] ss:$16 sps:$4 sm:$0xff]   ;;  %v1734_v11 = vld [vmem:[#allocation7 + $0x14c] ss:$16 sps:$4 sm:$0xff]  }
 0x106   :  { %v1973_v22 = vpack.c.bf16 %v220_v16, %v217_v14  ;;  %v219_v24 = vmax.f32 %v172_v20, 0.0  ;;  %v1975_v25 = vpack.c.bf16 %v218_v19, %v215_v15  ;;  %v1732_v12 = vld [vmem:[#allocation7 + $0x148] ss:$16 sps:$4 sm:$0xff]   ;;  %v1737_v13 = vld [vmem:[#allocation7 + $0x12c] ss:$16 sps:$4 sm:$0xff]  }
 0x107   :  { %v1735_v14 = vld [vmem:[#allocation7 + $0x128] ss:$16 sps:$4 sm:$0xff]   ;;  %v1740_v15 = vld [vmem:[#allocation7 + $0x10c] ss:$16 sps:$4 sm:$0xff]  }
 0x108   :  { %898 = vmatmul.mubr.bf16.vlgmr.msra.gmra.mxu1 %v1973_v22  ;;  %v222_v26 = vpack.c.bf16 %v219_v24, %v216_v18  ;;  %v1738_v16 = vld [vmem:[#allocation7 + $0x108] ss:$16 sps:$4 sm:$0xff]   ;;  %v1748_v18 = vld [vmem:[#allocation8 + $0x20] sm:$0xff]  }
 0x109   :  { %909 = vmatpush1.bf16.msra.mxu1 %v1669_v21  ;;  %v1749_v19 = vld [vmem:[#allocation8 + $0x58] sm:$0xff]   ;;  %v1751_v21 = vld [vmem:[#allocation8 + $0x50] sm:$0xff]   ;;  %v1754_v24 = vld [vmem:[#allocation8 + $0x8] sm:$0xff]  }
 0x10a   :  { %910 = vmatprep.subr.bf16.mxu1 %v1674_v23  ;;  %854 = vmatprep.mubr.bf16.mxu0 %v222_v26  ;;  %v1750_v20 = vld [vmem:[#allocation8 + $0x18] sm:$0xff]   ;;  %v1753_v23 = vld [vmem:[#allocation8 + $0x48] sm:$0xff]  }
 0x10b   :  { %940 = vmatprep.mubr.bf16.mxu1 %v222_v26  ;;  %855 = vmatmul.mubr.bf16.vlgmr.msra.gmra.mxu0 %v1975_v25  ;;  %v1755_v26 = vld [vmem:[#allocation8 + $0x40] sm:$0xff]  }
 0x10c   :  { %952 = vmatpush1.bf16.msra.mxu0 %v1675_v28  ;;  %983 = vmatprep.mubr.bf16.mxu0 %v1897_v1  ;;  %v1699_v1 = vld [vmem:[#allocation7 + $0x268] ss:$16 sps:$4 sm:$0xff]  }
 0x10d   :  { %911 = vmatpush1.bf16.msra.mxu1 %v1672_v27  ;;  %953 = vmatprep.subr.bf16.mxu0 %v1683_v30  ;;  %v1756_v27 = vld [vmem:[#allocation8] sm:$0xff]   ;;  %v1758_v28 = vld [vmem:[#allocation8 + $0xb8] sm:$0xff]   ;;  %v1760_v30 = vld [vmem:[#allocation8 + $0xb0] sm:$0xff]  }
 0x10e   :  { %912 = vmatprep.subr.bf16.mxu1 %v1680_v29  ;;  %v1759_v29 = vld [vmem:[#allocation8 + $0xf0] sm:$0xff]  }
 0x110   :  { %954 = vmatpush1.bf16.msra.mxu0 %v1681_v32  ;;  %v1762_v32 = vld [vmem:[#allocation8 + $0xa8] sm:$0xff]  }
 0x111   :  { %913 = vmatpush1.bf16.msra.mxu1 %v1678_v31  ;;  %955 = vmatprep.subr.bf16.mxu0 %v1689_v34  ;;  %v1761_v31 = vld [vmem:[#allocation8 + $0xe8] sm:$0xff]   ;;  %v1764_v34 = vld [vmem:[#allocation8 + $0xa0] sm:$0xff]  }
 0x112   :  { %914 = vmatprep.subr.bf16.mxu1 %v1686_v33  ;;  %v1763_v33 = vld [vmem:[#allocation8 + $0xe0] sm:$0xff]  }
 0x114   :  { %956 = vmatpush1.bf16.msra.mxu0 %v1687_v36  ;;  %v1766_v36 = vld [vmem:[#allocation8 + $0x98] sm:$0xff]  }
 0x115   :  { %915 = vmatpush1.bf16.msra.mxu1 %v1684_v35  ;;  %957 = vmatprep.subr.bf16.mxu0 %v1695_v38  ;;  %v1765_v35 = vld [vmem:[#allocation8 + $0xd8] sm:$0xff]   ;;  %v1768_v38 = vld [vmem:[#allocation8 + $0x90] sm:$0xff]  }
 0x116   :  { %916 = vmatprep.subr.bf16.mxu1 %v1692_v37  ;;  %v1767_v37 = vld [vmem:[#allocation8 + $0xd0] sm:$0xff]  }
 0x118   :  { %958 = vmatpush1.bf16.msra.mxu0 %v1693_v40  ;;  %v1770_v40 = vld [vmem:[#allocation8 + $0x88] sm:$0xff]  }
 0x119   :  { %917 = vmatpush1.bf16.msra.mxu1 %v1690_v39  ;;  %959 = vmatprep.subr.bf16.mxu0 %v1701_v42  ;;  %v1769_v39 = vld [vmem:[#allocation8 + $0xc8] sm:$0xff]   ;;  %v1772_v42 = vld [vmem:[#allocation8 + $0x80] sm:$0xff]  }
 0x11a   :  { %918 = vmatprep.subr.bf16.mxu1 %v1698_v41  ;;  %v1771_v41 = vld [vmem:[#allocation8 + $0xc0] sm:$0xff]  }
 0x11c   :  { %960 = vmatpush1.bf16.msra.mxu0 %v1699_v1  ;;  %v320_v1 = vld [vmem:[%s2005_s4] sm:$0xf] }
 0x11d   :  { %919 = vmatpush1.bf16.msra.mxu1 %v1696_v43  ;;  %961 = vmatprep.subr.bf16.mxu0 %v1707_v45 }
 0x11e   :  { %920 = vmatprep.subr.bf16.mxu1 %v1704_v44  ;;  %v329_v44 = vrot.slane %v320_v1, %v97_v61 }
 0x120   :  { %962 = vmatpush1.bf16.msra.mxu0 %v1705_v47 }
 0x121   :  { %921 = vmatpush1.bf16.msra.mxu1 %v1702_v46  ;;  %963 = vmatprep.subr.bf16.mxu0 %v1713_v49  ;;  %v325_v46 = vrot.slane %v320_v1, %v93_v59 }
 0x122   :  { %922 = vmatprep.subr.bf16.mxu1 %v1710_v48 }
 0x124   :  { %964 = vmatpush1.bf16.msra.mxu0 %v1711_v51 }
 0x125   :  { %923 = vmatpush1.bf16.msra.mxu1 %v1708_v50  ;;  %965 = vmatprep.subr.bf16.mxu0 %v1719_v53 }
 0x126   :  { %924 = vmatprep.subr.bf16.mxu1 %v1716_v52 }
 0x128   :  { %966 = vmatpush1.bf16.msra.mxu0 %v1717_v55 }
 0x129   :  { %925 = vmatpush2.bf16.msra.mxu1 %v1714_v54  ;;  %1528 = vmatprep.subr.bf16.mxu0 %v1741_v60 }
 0x12a   :  { %926 = vmatprep.subr.bf16.mxu1 %v1722_v56 }
 0x12b   :  { %984 = vmatmul.mubr.bf16.vlgmr.msra.gmra.mxu0 %v1973_v22  ;;  %v1752_v22 = vld [vmem:[#allocation8 + $0x10] sm:$0xff]  }
 0x12c   :  { %1529 = vmatpush3.bf16.msra.mxu0 %v1742_v63 }
 0x12d   :  { %927 = vmatpush2.bf16.msra.mxu1 %v1720_v62  ;;  %1530 = vmatprep.subr.bf16.mxu0 %v1743_v2 }
 0x12e   :  { %928 = vmatprep.subr.bf16.mxu1 %v1725_v0 }
 0x130   :  { %1531 = vmatpush3.bf16.msra.mxu0 %v1744_v4 }
 0x131   :  { %929 = vmatpush2.bf16.msra.mxu1 %v1723_v3  ;;  %1532 = vmatprep.subr.bf16.mxu0 %v1745_v6  ;;  %v336_v6 = vsub.s32 3, %v1959_v57 }
 0x132   :  { %930 = vmatprep.subr.bf16.mxu1 %v1728_v5 }
 0x134   :  { %1533 = vmatpush3.bf16.msra.mxu0 %v1746_v8  ;;  %v337_v8 = vrot.slane %v320_v1, %v336_v6 }
 0x135   :  { %931 = vmatpush2.bf16.msra.mxu1 %v1726_v7  ;;  %1534 = vmatprep.subr.bf16.mxu0 %v1747_v17 }
 0x136   :  { %932 = vmatprep.subr.bf16.mxu1 %v1731_v9 }
 0x138   :  { %1535 = vmatpush3.bf16.msra.mxu0 %v1748_v18 }
 0x139   :  { %933 = vmatpush2.bf16.msra.mxu1 %v1729_v10  ;;  %1536 = vmatprep.subr.bf16.mxu0 %v1749_v19  ;;  %v333_v10 = vrot.slane %v320_v1, %v101_v58 }
 0x13a   :  { %934 = vmatprep.subr.bf16.mxu1 %v1734_v11 }
 0x13c   :  { %1537 = vmatpush3.bf16.msra.mxu0 %v1750_v20 }
 0x13d   :  { %935 = vmatpush2.bf16.msra.mxu1 %v1732_v12  ;;  %1538 = vmatprep.subr.bf16.mxu0 %v1751_v21 }
 0x13e   :  { %936 = vmatprep.subr.bf16.mxu1 %v1737_v13 }
 0x140   :  { %1539 = vmatpush3.bf16.msra.mxu0 %v1752_v22 }
 0x141   :  { %937 = vmatpush2.bf16.msra.mxu1 %v1735_v14  ;;  %1540 = vmatprep.subr.bf16.mxu0 %v1753_v23 }
 0x142   :  { %938 = vmatprep.subr.bf16.mxu1 %v1740_v15 }
 0x144   :  { %1541 = vmatpush3.bf16.msra.mxu0 %v1754_v24 }
 0x145   :  { %939 = vmatpush2.bf16.msra.mxu1 %v1738_v16  ;;  %1542 = vmatprep.subr.bf16.mxu0 %v1755_v26 }
 0x148   :  { %941 = vmatmul.mubr.bf16.vlgmr.msra.gmra.mxu1 %v1975_v25  ;;  %1543 = vmatpush3.bf16.msra.mxu0 %v1756_v27  ;;  %v1757_v25 = vld [vmem:[#allocation8 + $0xf8] sm:$0xff]  }
 0x149   :  { %1550 = vmatprep.subr.bf16.mxu1 %v1757_v25 }
 0x14a   :  { %1551 = vmatpush3.bf16.msra.mxu1 %v1758_v28 }
 0x14b   :  { %1552 = vmatprep.subr.bf16.mxu1 %v1759_v29 }
 0x14e   :  { %1553 = vmatpush3.bf16.msra.mxu1 %v1760_v30 }
 0x14f   :  { %1554 = vmatprep.subr.bf16.mxu1 %v1761_v31 }
 0x152   :  { %1555 = vmatpush3.bf16.msra.mxu1 %v1762_v32 }
 0x153   :  { %1556 = vmatprep.subr.bf16.mxu1 %v1763_v33 }
 0x156   :  { %1557 = vmatpush3.bf16.msra.mxu1 %v1764_v34 }
 0x157   :  { %1558 = vmatprep.subr.bf16.mxu1 %v1765_v35  ;;  %v1484_v35 = vld [vmem:[%s2007_s6] ss:$0 sm:$0xff]  ;;  %s1857_s6 = scalar_lea.vmem %s1369_s28, 128 }
 0x158   :  { %p1858_p6 = scmp.ne.s32.totalorder %s1369_s28, %s1857_s6  ;;  %p1863_p8 = scmp.lt.s32.totalorder %s1857_s6, %s1857_s6 }
 0x15a   :  { %1559 = vmatpush3.bf16.msra.mxu1 %v1766_v36  ;;  %p1864_p9 = por %p1863_p8, %p1862_p7 }
 0x15b   :  { %1560 = vmatprep.subr.bf16.mxu1 %v1767_v37 }
 0x15c   :  { %p1865_p10 = pnand %p1864_p9, %p1858_p6 }
 0x15e   :  { %1561 = vmatpush3.bf16.msra.mxu1 %v1768_v38 }
 0x15f   :  { %1562 = vmatprep.subr.bf16.mxu1 %v1769_v39 }
 0x162   :  { %1563 = vmatpush3.bf16.msra.mxu1 %v1770_v40 }
 0x163   :  { %1564 = vmatprep.subr.bf16.mxu1 %v1771_v41 }
 0x166   :  { %1565 = vmatpush3.bf16.msra.mxu1 %v1772_v42 }
 0x1c8   :  { %v899_v43 = vpop.f32.mrf.mxu1 }
 0x1ca   :  { %v901_v45 = vpop.f32.mrf.mxu1 }
 0x1cb   :  { %v856_v47 = vpop.f32.mrf.mxu0 }
 0x1cc   :  { %v857_v50 = vadd.f32 %v856_v47, %v325_v46  ;;  %v903_v51 = vpop.f32.mrf.mxu1 }
 0x1cd   :  { %v858_v48 = vpop.f32.mrf.mxu0 }
 0x1ce   :  { %v859_v49 = vadd.f32 %v858_v48, %v329_v44  ;;  %v900_v62 = vadd.f32 %v899_v43, %v857_v50  ;;  %v905_v63 = vpop.f32.mrf.mxu1 }
 0x1cf   :  { %v860_v52 = vpop.f32.mrf.mxu0 }
 0x1d0   :  { %v861_v53 = vadd.f32 %v860_v52, %v325_v46  ;;  %v902_v55 = vadd.f32 %v901_v45, %v859_v49  ;;  %v994_v4 = vmax.f32 %v900_v62, 0.0 }
 0x1d1   :  { %v862_v54 = vpop.f32.mrf.mxu0 }
 0x1d2   :  { %v904_v56 = vadd.f32 %v903_v51, %v861_v53  ;;  %v863_v60 = vadd.f32 %v862_v54, %v329_v44  ;;  %v995_v61 = vmax.f32 %v902_v55, 0.0 }
 0x1d4   :  { %v906_v0 = vadd.f32 %v905_v63, %v863_v60  ;;  %v998_v2 = vmax.f32 %v904_v56, 0.0 }
 0x1d6   :  { %v999_v3 = vmax.f32 %v906_v0, 0.0  ;;  %v1002_v59 = vpack.c.bf16 %v998_v2, %v994_v4 }
 0x1d8   :  { %v1003_v5 = vpack.c.bf16 %v999_v3, %v995_v61 }
 0x1da   :  { %1301 = vmatprep.mubr.bf16.mxu0 %v1003_v5 }
 0x1db   :  { %1302 = vmatmul.mubr.bf16.vlgmr.msra.gmra.mxu0 %v1002_v59 }
 0x1eb   :  { %v985_v7 = vpop.f32.mrf.mxu0 }
 0x1ed   :  { %v987_v9 = vpop.f32.mrf.mxu0 }
 0x1ef   :  { %v989_v14 = vpop.f32.mrf.mxu0 }
 0x1f1   :  { %v991_v22 = vpop.f32.mrf.mxu0 }
 0x208   :  { %v942_v11 = vpop.f32.mrf.mxu1 }
 0x209   :  { %v943_v15 = vadd.f32 %v942_v11, %v333_v10 }
 0x20a   :  { %v944_v12 = vpop.f32.mrf.mxu1 }
 0x20b   :  { %v945_v13 = vadd.f32 %v944_v12, %v337_v8  ;;  %v986_v23 = vadd.f32 %v985_v7, %v943_v15 }
 0x20c   :  { %v946_v16 = vpop.f32.mrf.mxu1 }
 0x20d   :  { %v947_v17 = vadd.f32 %v946_v16, %v333_v10  ;;  %v988_v19 = vadd.f32 %v987_v9, %v945_v13  ;;  %v996_v28 = vmax.f32 %v986_v23, 0.0 }
 0x20e   :  { %v948_v18 = vpop.f32.mrf.mxu1 }
 0x20f   :  { %v990_v20 = vadd.f32 %v989_v14, %v947_v17  ;;  %v949_v21 = vadd.f32 %v948_v18, %v337_v8  ;;  %v997_v27 = vmax.f32 %v988_v19, 0.0 }
 0x211   :  { %v992_v24 = vadd.f32 %v991_v22, %v949_v21  ;;  %v1000_v26 = vmax.f32 %v990_v20, 0.0 }
 0x213   :  { %v1001_v25 = vmax.f32 %v992_v24, 0.0  ;;  %v1004_v58 = vpack.c.bf16 %v1000_v26, %v996_v28 }
 0x215   :  { %v1005_v57 = vpack.c.bf16 %v1001_v25, %v997_v27 }
 0x217   :  { %1342 = vmatprep.mubr.bf16.mxu1 %v1005_v57 }
 0x218   :  { %1343 = vmatmul.mubr.bf16.vlgmr.msra.gmra.mxu1 %v1004_v58 }
 0x29b   :  { %v1544_v29 = vpop.f32.mrf.mxu0 }
 0x29d   :  { %v1545_v30 = vpop.f32.mrf.mxu0 }
 0x29e   :  { %v1546_v32 = vadd.f32 %v1545_v30, %v1544_v29 }
 0x29f   :  { %v1547_v31 = vpop.f32.mrf.mxu0 }
 0x2a0   :  { %v1304_v39 = vadd.f32 %v1546_v32, %v1484_v35 }
 0x2a1   :  { %v1548_v33 = vpop.f32.mrf.mxu0 }
 0x2a2   :  { %v1549_v37 = vadd.f32 %v1548_v33, %v1547_v31 }
 0x2a4   :  { %v1307_v43 = vadd.f32 %v1549_v37, %v1484_v35 }
 0x2d8   :  { %v1566_v34 = vpop.f32.mrf.mxu1 }
 0x2da   :  { %v1567_v36 = vpop.f32.mrf.mxu1 }
 0x2db   :  { %v1568_v38 = vadd.f32 %v1567_v36, %v1566_v34 }
 0x2dc   :  { %v1569_v40 = vpop.f32.mrf.mxu1 }
 0x2dd   :  { %v1345_v41 = vadd.f32 %v1568_v38, %v1304_v39 }
 0x2de   :  { %v1570_v42 = vpop.f32.mrf.mxu1 }
 0x2df   :  { %v1571_v1 = vadd.f32 %v1570_v42, %v1569_v40  ;;  %1773 = vtanh.f32 %v1345_v41 }
 0x2e1   :  { %v1348_v44 = vadd.f32 %v1571_v1, %v1307_v43 }
 0x2e3   :  { %1775 = vtanh.f32 %v1348_v44 }
 0x2ec   :  { %v1774_v45 = vpop.eup %1773 }
 0x2f0   :  { %v1776_v46 = vpop.eup %1775 }
 0x2f1   :  { %v1524_v47 = vpack.c.bf16 %v1776_v46, %v1774_v45 }
 0x2f3   :  { %1525 = vst [vmem:[#allocation10] sm:$0xff] %v1524_v47  }
 0x2f4   :  { %1868 = shalt.err (!%p1865_p10)
}
 0x2f5   :  { %1374 = dma.vmem_to_hbm [thread:$0]  %s1369_s28, 128, %s2008_s7, [#allocation4], %s1889_s11, %s1889_s11, %s1890_s12  }
 0x2f6   :  { %1883 = dma.done.wait [#allocation4], 128  }
 0x2f7   :  { %1884 = vsyncadd [#allocation4], 4294967168 }
 0x2f8   :  { %1378 = vsyncpa [#allocation3], 1 }
 0x2f9   :  { %1379 = vsyncpa [#allocation6], 1 }
 0x2fa   :  { %1380 = vsyncpa [#allocation9], 1 }
 0x2fb   :  { %1381 = vsyncpa [#allocation4], 1 }

</bundles_post_ra>
